<compile_context>
chip_gen: v5e
topology: v5e:2x2
jax: 0.10.0
libtpu: 0.0.40
codegen_flags: <defaults>
</compile_context>

<pallas_src>
import functools

import jax
import jax.numpy as jnp
from jax import lax
from jax.experimental import pallas as pl
from jax.experimental.pallas import tpu as pltpu


def _round_up(x, m):
    return ((x + m - 1) // m) * m


def _cdiv(a, b):
    return -(-a // b)


def _vmem_physical_bytes():
    """Best-effort physical VMEM query; conservative (v7x, 64 MiB) fallback."""
    try:
        info = pltpu.get_tpu_info()
        for attr in ("vmem_capacity_bytes", "vmem_size_bytes", "vmem_bytes"):
            v = getattr(info, attr, None)
            if v:
                return int(v)
    except Exception:
        pass
    return 64 * 1024 * 1024


def _se_kernel(x1_ref, x2_ref, a_ref, b_ref, o_ref, *,
               tn, gamma, sigma2, x2_resident, dot_bf16, exp_bf16):
    # x1_ref : (tm, D)                        VMEM row tile of X1
    # x2_ref : (N2p, D) if x2_resident else (tn, D)
    # a_ref  : (tm, 1)  f32 row norms of X1
    # b_ref  : (1, tn)  f32 row norms of X2
    # o_ref  : (tm, tn) output tile
    if x2_resident:
        # Whole X2 is resident in VMEM; slice out this column tile.
        col = pl.multiple_of(pl.program_id(1) * tn, tn)
        x2 = x2_ref[pl.ds(col, tn), :]
    else:
        x2 = x2_ref[...]
    x1 = x1_ref[...]
    if dot_bf16:
        # Only enabled for large D (matmul-bound); A/B and accumulation stay f32.
        x1 = x1.astype(jnp.bfloat16)
        x2 = x2.astype(jnp.bfloat16)
    # X1 @ X2.T via direct contraction of feature dims (no transpose on VMEM tile).
    c = lax.dot_general(
        x1, x2,
        dimension_numbers=(((1,), (1,)), ((), ())),
        preferred_element_type=jnp.float32)                     # (tm, tn)
    d = (a_ref[...] + b_ref[...]) - 2.0 * c
    e = gamma * d                                               # gamma = -0.5/ell^2
    if exp_bf16:
        # bf16 EUP exp (v6e/v7x) -- only used when the output dtype is bf16.
        e = e.astype(jnp.bfloat16)
    o_ref[...] = (sigma2 * jnp.exp(e)).astype(o_ref.dtype)


def se_kernel(X1, X2, ell=1.0, sigma=1.0, *, tm=512, tn=1024, out_dtype=None):
    """Pallas SEKernel forward. X1: (N1, D), X2: (N2, D) -> (N1, N2)."""
    N1, D = X1.shape
    N2, D2 = X2.shape
    assert D == D2, "feature dims must match"

    if out_dtype is None:
        out_dtype = X1.dtype
    out_dtype = jnp.dtype(out_dtype)
    in_itemsize = jnp.dtype(X1.dtype).itemsize
    out_itemsize = out_dtype.itemsize
    Dp_lanes = _round_up(D, 128)          # lane padding of the D axis in VMEM

    # ---- per-generation VMEM budget ---------------------------------------
    phys_vmem = _vmem_physical_bytes()
    budget = max(32 * 1024 * 1024, min(3 * phys_vmem // 4, 96 * 1024 * 1024))

    # ---- tile selection (shrink if estimate would not fit) ----------------
    tm_eff = min(tm, _round_up(N1, 8))        # sublane multiple of 8
    tn_eff = min(tn, _round_up(N2, 128))      # lane-dense: multiple of 128

    def vmem_use(tm_e, tn_e, n2p, resident):
        out_b = 2 * tm_e * tn_e * out_itemsize            # double-buffered out tile
        x1_b = 2 * tm_e * Dp_lanes * in_itemsize
        x2_rows = n2p if resident else tn_e
        x2_b = 2 * x2_rows * Dp_lanes * in_itemsize
        a_b = 2 * tm_e * 128 * 4                          # (tm,1) lane-padded
        b_b = 2 * 8 * tn_e * 4                            # (1,tn) sublane-padded
        return out_b + x1_b + x2_b + a_b + b_b

    while True:
        N1p = _round_up(N1, tm_eff)
        N2p = _round_up(N2, tn_eff)
        resident = vmem_use(tm_eff, tn_eff, N2p, True) <= budget
        if vmem_use(tm_eff, tn_eff, N2p, resident) <= budget:
            break
        if tn_eff > 128:
            tn_eff = max(128, _round_up(tn_eff // 2, 128))
        elif tm_eff > 8:
            tm_eff = max(8, _round_up(tm_eff // 2, 8))
        else:
            break  # minimal tiles; rely on the compiler's VMEM limit

    # ---- zero padding (handles arbitrary N1 / N2) --------------------------
    if N1p != N1:
        X1 = jnp.pad(X1, ((0, N1p - N1), (0, 0)))
    if N2p != N2:
        X2 = jnp.pad(X2, ((0, N2p - N2), (0, 0)))

    # ---- hoisted precomputation (plain XLA, runs once) ----------------------
    A = jnp.sum(X1.astype(jnp.float32) ** 2, axis=1, keepdims=True)      # (N1p, 1)
    B = jnp.sum(X2.astype(jnp.float32) ** 2, axis=1, keepdims=True).T    # (1, N2p)

    # Compile-time constants (scalars baked into the kernel).
    gamma = float(-0.5 / (float(ell) * float(ell)))
    sigma2 = float(sigma) * float(sigma)

    dot_bf16 = (D >= 256) and (jnp.dtype(X1.dtype) == jnp.float32)
    exp_bf16 = (out_dtype == jnp.dtype(jnp.bfloat16))

    kernel_fn = functools.partial(
        _se_kernel, tn=tn_eff, gamma=gamma, sigma2=sigma2,
        x2_resident=resident, dot_bf16=dot_bf16, exp_bf16=exp_bf16)

    if resident:
        # Full-extent block + constant index_map: X2 DMA'd once, kept resident.
        x2_spec = pl.BlockSpec((N2p, D), lambda i, j: (0, 0))
    else:
        x2_spec = pl.BlockSpec((tn_eff, D), lambda i, j: (j, 0))

    grid = (N1p // tm_eff, N2p // tn_eff)

    grid_spec = pltpu.PrefetchScalarGridSpec(
        num_scalar_prefetch=0,
        grid=grid,
        in_specs=[
            pl.BlockSpec((tm_eff, D), lambda i, j: (i, 0)),      # X1 row tile
            x2_spec,                                             # X2 (resident/streamed)
            pl.BlockSpec((tm_eff, 1), lambda i, j: (i, 0)),      # A
            pl.BlockSpec((1, tn_eff), lambda i, j: (0, j)),      # B
        ],
        out_specs=pl.BlockSpec((tm_eff, tn_eff), lambda i, j: (i, j)),
    )

    row_sweeps = _cdiv(N1p, tm_eff)
    x2_reads = 1 if resident else row_sweeps
    cost = pl.CostEstimate(
        flops=2 * N1p * N2p * D + 4 * N1p * N2p,
        transcendentals=N1p * N2p,
        bytes_accessed=(N1p * D * in_itemsize                 # X1 once
                        + x2_reads * N2p * D * in_itemsize    # X2 (re)reads
                        + N1p * 4                             # A once per row tile
                        + row_sweeps * N2p * 4                # B once per row sweep
                        + N1p * N2p * out_itemsize),          # output writeback
    )

    out = pl.pallas_call(
        kernel_fn,
        out_shape=jax.ShapeDtypeStruct((N1p, N2p), out_dtype),
        grid_spec=grid_spec,
        compiler_params=pltpu.CompilerParams(
            dimension_semantics=("parallel", "parallel"),
            vmem_limit_bytes=int(budget),
        ),
        cost_estimate=cost,
    )(X1, X2, A, B)

    if N1p != N1 or N2p != N2:
        out = out[:N1, :N2]
    return out


def se_kernel_ref(X1, X2, ell=1.0, sigma=1.0):
    """Pure-JAX reference matching the PyTorch module (f32-accurate matmul)."""
    A = jnp.sum(X1 ** 2, axis=1, keepdims=True)
    B = jnp.sum(X2 ** 2, axis=1, keepdims=True).T
    C = 2.0 * jnp.matmul(X1, X2.T, precision=lax.Precision.HIGHEST)
    D = A + B - C
    return (sigma ** 2) * jnp.exp(-0.5 * D / (ell ** 2))


if __name__ == "__main__":
    key = jax.random.PRNGKey(0)
    k1, k2, k3, k4 = jax.random.split(key, 4)

    # --- Small test (module-scale shapes, single tile) ----------------------
    N1, N2, D = 64, 32, 16
    X1 = jax.random.normal(k1, (N1, D), dtype=jnp.float32)
    X2 = jax.random.normal(k2, (N2, D), dtype=jnp.float32)
    ell, sigma = 1.0, 1.0   # matches nn.Module __init__ defaults

    out = jax.block_until_ready(se_kernel(X1, X2, ell=ell, sigma=sigma))
    ref = se_kernel_ref(X1, X2, ell=ell, sigma=sigma)
    assert out.shape == (N1, N2)
    assert jnp.allclose(out, ref, atol=1e-5, rtol=1e-5), "small-shape mismatch"

    # --- Multi-tile / padding / resident-X2 smoke test ----------------------
    M1, M2, DF = 1200, 2700, 48
    Y1 = 0.5 * jax.random.normal(k3, (M1, DF), dtype=jnp.float32)
    Y2 = 0.5 * jax.random.normal(k4, (M2, DF), dtype=jnp.float32)
    out2 = jax.block_until_ready(se_kernel(Y1, Y2, ell=1.3, sigma=0.7))
    ref2 = se_kernel_ref(Y1, Y2, ell=1.3, sigma=0.7)
    assert out2.shape == (M1, M2)
    assert jnp.allclose(out2, ref2, atol=1e-4, rtol=1e-4), "multi-tile mismatch"

    print("KERNEL_OK")
</pallas_src>

<mosaic_0001>
module attributes {stable_mosaic.version = 11 : i64} {
  func.func @_se_kernel(%arg0: i32, %arg1: i32, %arg2: memref<64x16xf32, #tpu.memory_space<vmem>>, %arg3: memref<128x16xf32, #tpu.memory_space<vmem>>, %arg4: memref<64x1xf32, #tpu.memory_space<vmem>>, %arg5: memref<1x128xf32, #tpu.memory_space<vmem>>, %arg6: memref<64x128xf32, #tpu.memory_space<vmem>>) attributes {dimension_semantics = [#tpu.dimension_semantics<parallel>, #tpu.dimension_semantics<parallel>], iteration_bounds = array<i64: 1, 1>, scalar_prefetch = 0 : i64, scratch_operands = 0 : i64, tpu.core_type = #tpu.core_type<tc>, window_params = [{transform_indices = @transform_0, window_bounds = array<i64: 64, 16>}, {pipeline_mode = #tpu.pipeline_mode<synchronous>, transform_indices = @transform_1, window_bounds = array<i64: 128, 16>}, {transform_indices = @transform_2, window_bounds = array<i64: 64, 1>}, {transform_indices = @transform_3, window_bounds = array<i64: 1, 128>}, {transform_indices = @transform_4, window_bounds = array<i64: 64, 128>}]} {
    %c128_i32 = arith.constant 128 : i32
    %0 = arith.muli %arg1, %c128_i32 : i32
    %1 = tpu.assume_multiple %0, 128 : i32
    %2 = arith.index_cast %1 : i32 to index
    %c0 = arith.constant 0 : index
    %3 = vector.load %arg3[%2, %c0] : memref<128x16xf32, #tpu.memory_space<vmem>>, vector<128x16xf32>
    %c0_0 = arith.constant 0 : index
    %c0_1 = arith.constant 0 : index
    %4 = vector.load %arg2[%c0_0, %c0_1] : memref<64x16xf32, #tpu.memory_space<vmem>>, vector<64x16xf32>
    %cst = arith.constant dense<0.000000e+00> : vector<64x128xf32>
    %5 = tpu.matmul %4, %3, %cst {dimension_numbers = #tpu.dot_dimension_numbers<[1], [1], [0], [0], [0, 0, 1, 0], [], []>} : vector<64x16xf32>, vector<128x16xf32>, vector<64x128xf32> -> vector<64x128xf32>
    %c0_2 = arith.constant 0 : index
    %c0_3 = arith.constant 0 : index
    %6 = vector.load %arg4[%c0_2, %c0_3] : memref<64x1xf32, #tpu.memory_space<vmem>>, vector<64x1xf32>
    %c0_4 = arith.constant 0 : index
    %c0_5 = arith.constant 0 : index
    %7 = vector.load %arg5[%c0_4, %c0_5] : memref<1x128xf32, #tpu.memory_space<vmem>>, vector<1x128xf32>
    %8 = vector.broadcast %6 : vector<64x1xf32> to vector<64x128xf32>
    %9 = vector.broadcast %7 : vector<1x128xf32> to vector<64x128xf32>
    %10 = arith.addf %8, %9 : vector<64x128xf32>
    %cst_6 = arith.constant 2.000000e+00 : f32
    %11 = vector.broadcast %cst_6 : f32 to vector<64x128xf32>
    %12 = arith.mulf %11, %5 : vector<64x128xf32>
    %13 = arith.subf %10, %12 : vector<64x128xf32>
    %cst_7 = arith.constant -5.000000e-01 : f32
    %14 = vector.broadcast %cst_7 : f32 to vector<64x128xf32>
    %15 = arith.mulf %14, %13 : vector<64x128xf32>
    %16 = math.exp %15 : vector<64x128xf32>
    %cst_8 = arith.constant 1.000000e+00 : f32
    %17 = vector.broadcast %cst_8 : f32 to vector<64x128xf32>
    %18 = arith.mulf %17, %16 : vector<64x128xf32>
    %c0_9 = arith.constant 0 : index
    %c0_10 = arith.constant 0 : index
    %19 = vector.load %arg6[%c0_9, %c0_10] : memref<64x128xf32, #tpu.memory_space<vmem>>, vector<64x128xf32>
    tpu.vector_store %arg6[%c0_9, %c0_10], %18 {strides = array<i32>} : memref<64x128xf32, #tpu.memory_space<vmem>>, vector<64x128xf32>,
    return
  }
  func.func @transform_0(%arg0: i32, %arg1: i32) -> (i32, i32) {
    %c0_i32 = arith.constant 0 : i32
    %c0_i32_0 = arith.constant 0 : i32
    return %arg0, %c0_i32 : i32, i32
  }
  func.func @transform_1(%arg0: i32, %arg1: i32) -> (i32, i32) {
    %c0_i32 = arith.constant 0 : i32
    %c0_i32_0 = arith.constant 0 : i32
    %c0_i32_1 = arith.constant 0 : i32
    return %c0_i32, %c0_i32_0 : i32, i32
  }
  func.func @transform_2(%arg0: i32, %arg1: i32) -> (i32, i32) {
    %c0_i32 = arith.constant 0 : i32
    %c0_i32_0 = arith.constant 0 : i32
    return %arg0, %c0_i32 : i32, i32
  }
  func.func @transform_3(%arg0: i32, %arg1: i32) -> (i32, i32) {
    %c0_i32 = arith.constant 0 : i32
    %c0_i32_0 = arith.constant 0 : i32
    return %c0_i32, %arg1 : i32, i32
  }
  func.func @transform_4(%arg0: i32, %arg1: i32) -> (i32, i32) {
    %c0_i32 = arith.constant 0 : i32
    return %arg0, %arg1 : i32, i32
  }
}

</mosaic_0001>

<bundles_post_ra>
// kernel: tpu_custom_call.1
= control target key start
LH: loop header
LB: loop body
LE: loop exit
PB: predicated region body
PF: predicated region fallthrough
CT: control target
= control target key end

     0   :  { %vm44_vm0 = vcmask 130048   ;;  %s609_s0 = inlined_call_operand.vmem [shape: f32[64,16], index: 0, kind: input, shape index: {}]   ;;  %s610_s1 = inlined_call_operand.vmem [shape: f32[128,16], index: 1, kind: input, shape index: {}]   ;;  %s611_s2 = inlined_call_operand.vmem [shape: f32[64,1], index: 2, kind: input, shape index: {}]   ;;  %s612_s3 = inlined_call_operand.vmem [shape: f32[1,128], index: 3, kind: input, shape index: {}]   ;;  %s613_s4 = inlined_call_operand.hbm [shape: f32[64,128], index: 4, kind: output, shape index: {}]  }
   0x1   :  { %v35_v0 = vld [vmem:[%s610_s1 + $0x78] sm:$0xff]  ;;  %v34_v1 = vld [vmem:[%s610_s1 + $0x70] sm:$0xff] }
   0x2   :  { %284 = vmatpush.xpose.msk.msra.mxu0 %vm44_vm0, %v35_v0  ;;  %308 = vmatpush.xpose.msk.msra.mxu1 %vm44_vm0, %v35_v0 }
   0x3   :  { %309 = vmatpush.xpose.msk.msra.mxu2 %vm44_vm0, %v35_v0  ;;  %310 = vmatpush.xpose.msk.msra.mxu3 %vm44_vm0, %v35_v0 }
   0x4   :  { %9 = vsyncpa [#allocation3], 0  ;;  %v33_v2 = vld [vmem:[%s610_s1 + $0x68] sm:$0xff]  ;;  %v32_v3 = vld [vmem:[%s610_s1 + $0x60] sm:$0xff]  ;;  %v406_v9 = vmov 0   ;;  %s272_s29 = sshll.u32 %s613_s4, 4  ;;  %s273_s29 = int_to_ptr.hbm [resolvable:$true] %s272_s29 }
   0x5   :  { %v31_v4 = vld [vmem:[%s610_s1 + $0x58] sm:$0xff]  ;;  %v30_v5 = vld [vmem:[%s610_s1 + $0x50] sm:$0xff]  ;;  %v29_v6 = vld [vmem:[%s610_s1 + $0x48] sm:$0xff]  ;;  %361 = vset.pattern.permute.xlu1 %v406_v9  ;;  %360 = vset.pattern.permute.xlu0 %v406_v9  ;;  %s408_s30 = smov 128   ;;  %s409_s5 = smov 8  }
   0x6   :  { %285 = vmatpush.xpose.msk.msra.mxu0 %vm44_vm0, %v34_v1  ;;  %311 = vmatpush.xpose.msk.msra.mxu1 %vm44_vm0, %v34_v1  ;;  %v160_v7 = vld [vmem:[%s611_s2 + $0x10] sm:$0xff]  ;;  %v158_v8 = vld [vmem:[%s611_s2] sm:$0xff]  ;;  %v27_v11 = vld [vmem:[%s610_s1 + $0x38] sm:$0xff] }
   0x7   :  { %312 = vmatpush.xpose.msk.msra.mxu2 %vm44_vm0, %v34_v1  ;;  %313 = vmatpush.xpose.msk.msra.mxu3 %vm44_vm0, %v34_v1  ;;  %v28_v10 = vld [vmem:[%s610_s1 + $0x40] sm:$0xff]  ;;  %v161_v12 = vld [vmem:[%s611_s2 + $0x18] sm:$0xff]  ;;  %v159_v13 = vld [vmem:[%s611_s2 + $0x8] sm:$0xff] }
   0x8   :  { %179 = vperm.xlu1 %361, %v160_v7   ;;  %169 = vperm.xlu0 %360, %v158_v8   ;;  %v26_v14 = vld [vmem:[%s610_s1 + $0x30] sm:$0xff]  ;;  %v25_v15 = vld [vmem:[%s610_s1 + $0x28] sm:$0xff]  ;;  %v165_v16 = vld [vmem:[%s611_s2 + $0x38] sm:$0xff] }
   0x9   :  { %362 = vset.pattern.permute.xlu2 %v406_v9  ;;  %v164_v17 = vld [vmem:[%s611_s2 + $0x30] sm:$0xff]  ;;  %v162_v18 = vld [vmem:[%s611_s2 + $0x20] sm:$0xff]  ;;  %v23_v20 = vld [vmem:[%s610_s1 + $0x18] sm:$0xff] }
   0xa   :  { %286 = vmatpush.xpose.msk.msra.mxu0 %vm44_vm0, %v33_v2  ;;  %314 = vmatpush.xpose.msk.msra.mxu1 %vm44_vm0, %v33_v2  ;;  %v24_v19 = vld [vmem:[%s610_s1 + $0x20] sm:$0xff]  ;;  %v163_v21 = vld [vmem:[%s611_s2 + $0x28] sm:$0xff]  ;;  %v22_v22 = vld [vmem:[%s610_s1 + $0x10] sm:$0xff] }
   0xb   :  { %315 = vmatpush.xpose.msk.msra.mxu2 %vm44_vm0, %v33_v2  ;;  %316 = vmatpush.xpose.msk.msra.mxu3 %vm44_vm0, %v33_v2  ;;  %v21_v23 = vld [vmem:[%s610_s1 + $0x8] sm:$0xff]  ;;  %v20_v24 = vld [vmem:[%s610_s1] sm:$0xff]  ;;  %v38_v26 = vld [vmem:[%s609_s0 + $0x10] sm:$0xff] }
   0xc   :  { %189 = vperm.xlu2 %362, %v162_v18   ;;  %v36_v25 = vld [vmem:[%s609_s0] sm:$0xff]  ;;  %v42_v28 = vld [vmem:[%s609_s0 + $0x30] sm:$0xff]  ;;  %v37_v29 = vld [vmem:[%s609_s0 + $0x8] sm:$0xff] }
   0xd   :  { %v40_v27 = vld [vmem:[%s609_s0 + $0x20] sm:$0xff]  ;;  %v39_v30 = vld [vmem:[%s609_s0 + $0x18] sm:$0xff]  ;;  %v41_v31 = vld [vmem:[%s609_s0 + $0x28] sm:$0xff] }
   0xe   :  { %287 = vmatpush.xpose.msk.msra.mxu0 %vm44_vm0, %v32_v3  ;;  %317 = vmatpush.xpose.msk.msra.mxu1 %vm44_vm0, %v32_v3  ;;  %v43_v32 = vld [vmem:[%s609_s0 + $0x38] sm:$0xff]  ;;  %v363_v36 = vld [vmem:[%s612_s3] ss:$0 sm:$0xff]  ;;  %s407_s0 = smov [#allocation2]  }
   0xf   :  { %318 = vmatpush.xpose.msk.msra.mxu2 %vm44_vm0, %v32_v3  ;;  %319 = vmatpush.xpose.msk.msra.mxu3 %vm44_vm0, %v32_v3  ;;  %s270_s3 = sshll.u32 %s407_s0, 4  ;;  %s271_s3 = int_to_ptr.vmem [resolvable:$true] %s270_s3 }
  0x10   :  { %184 = vperm.xlu1 %361, %v161_v12   ;;  %174 = vperm.xlu0 %360, %v159_v13  }
  0x12   :  { %288 = vmatpush.xpose.msk.msra.mxu0 %vm44_vm0, %v31_v4  ;;  %320 = vmatpush.xpose.msk.msra.mxu1 %vm44_vm0, %v31_v4 }
  0x13   :  { %321 = vmatpush.xpose.msk.msra.mxu2 %vm44_vm0, %v31_v4  ;;  %322 = vmatpush.xpose.msk.msra.mxu3 %vm44_vm0, %v31_v4 }
  0x14   :  { %194 = vperm.xlu2 %362, %v163_v21  }
  0x16   :  { %289 = vmatpush.xpose.msk.msra.mxu0 %vm44_vm0, %v30_v5  ;;  %323 = vmatpush.xpose.msk.msra.mxu1 %vm44_vm0, %v30_v5 }
  0x17   :  { %324 = vmatpush.xpose.msk.msra.mxu2 %vm44_vm0, %v30_v5  ;;  %325 = vmatpush.xpose.msk.msra.mxu3 %vm44_vm0, %v30_v5 }
  0x18   :  { %204 = vperm.xlu1 %361, %v165_v16   ;;  %199 = vperm.xlu0 %360, %v164_v17  }
  0x1a   :  { %290 = vmatpush.xpose.msk.msra.mxu0 %vm44_vm0, %v29_v6  ;;  %326 = vmatpush.xpose.msk.msra.mxu1 %vm44_vm0, %v29_v6 }
  0x1b   :  { %327 = vmatpush.xpose.msk.msra.mxu2 %vm44_vm0, %v29_v6  ;;  %328 = vmatpush.xpose.msk.msra.mxu3 %vm44_vm0, %v29_v6 }
  0x1e   :  { %291 = vmatpush.xpose.msk.msra.mxu0 %vm44_vm0, %v28_v10  ;;  %329 = vmatpush.xpose.msk.msra.mxu1 %vm44_vm0, %v28_v10 }
  0x1f   :  { %330 = vmatpush.xpose.msk.msra.mxu2 %vm44_vm0, %v28_v10  ;;  %331 = vmatpush.xpose.msk.msra.mxu3 %vm44_vm0, %v28_v10 }
  0x22   :  { %292 = vmatpush.xpose.msk.msra.mxu0 %vm44_vm0, %v27_v11  ;;  %332 = vmatpush.xpose.msk.msra.mxu1 %vm44_vm0, %v27_v11 }
  0x23   :  { %333 = vmatpush.xpose.msk.msra.mxu2 %vm44_vm0, %v27_v11  ;;  %334 = vmatpush.xpose.msk.msra.mxu3 %vm44_vm0, %v27_v11 }
  0x26   :  { %293 = vmatpush.xpose.msk.msra.mxu0 %vm44_vm0, %v26_v14  ;;  %335 = vmatpush.xpose.msk.msra.mxu1 %vm44_vm0, %v26_v14 }
  0x27   :  { %336 = vmatpush.xpose.msk.msra.mxu2 %vm44_vm0, %v26_v14  ;;  %337 = vmatpush.xpose.msk.msra.mxu3 %vm44_vm0, %v26_v14 }
  0x2a   :  { %294 = vmatpush.xpose.msk.msra.mxu0 %vm44_vm0, %v25_v15  ;;  %338 = vmatpush.xpose.msk.msra.mxu1 %vm44_vm0, %v25_v15 }
  0x2b   :  { %339 = vmatpush.xpose.msk.msra.mxu2 %vm44_vm0, %v25_v15  ;;  %340 = vmatpush.xpose.msk.msra.mxu3 %vm44_vm0, %v25_v15 }
  0x2e   :  { %295 = vmatpush.xpose.msk.msra.mxu0 %vm44_vm0, %v24_v19  ;;  %341 = vmatpush.xpose.msk.msra.mxu1 %vm44_vm0, %v24_v19 }
  0x2f   :  { %342 = vmatpush.xpose.msk.msra.mxu2 %vm44_vm0, %v24_v19  ;;  %343 = vmatpush.xpose.msk.msra.mxu3 %vm44_vm0, %v24_v19 }
  0x32   :  { %296 = vmatpush.xpose.msk.msra.mxu0 %vm44_vm0, %v23_v20  ;;  %344 = vmatpush.xpose.msk.msra.mxu1 %vm44_vm0, %v23_v20 }
  0x33   :  { %345 = vmatpush.xpose.msk.msra.mxu2 %vm44_vm0, %v23_v20  ;;  %346 = vmatpush.xpose.msk.msra.mxu3 %vm44_vm0, %v23_v20 }
  0x36   :  { %297 = vmatpush.xpose.msk.msra.mxu0 %vm44_vm0, %v22_v22  ;;  %347 = vmatpush.xpose.msk.msra.mxu1 %vm44_vm0, %v22_v22 }
  0x37   :  { %348 = vmatpush.xpose.msk.msra.mxu2 %vm44_vm0, %v22_v22  ;;  %349 = vmatpush.xpose.msk.msra.mxu3 %vm44_vm0, %v22_v22 }
  0x3a   :  { %298 = vmatpush.xpose.msk.msra.mxu0 %vm44_vm0, %v21_v23  ;;  %350 = vmatpush.xpose.msk.msra.mxu1 %vm44_vm0, %v21_v23 }
  0x3b   :  { %351 = vmatpush.xpose.msk.msra.mxu2 %vm44_vm0, %v21_v23  ;;  %352 = vmatpush.xpose.msk.msra.mxu3 %vm44_vm0, %v21_v23 }
  0x3e   :  { %299 = vmatpush.xpose.msk.msra.mxu0 %vm44_vm0, %v20_v24  ;;  %353 = vmatpush.xpose.msk.msra.mxu1 %vm44_vm0, %v20_v24 }
  0x3f   :  { %354 = vmatpush.xpose.msk.msra.mxu2 %vm44_vm0, %v20_v24  ;;  %355 = vmatpush.xpose.msk.msra.mxu3 %vm44_vm0, %v20_v24 }
  0x41   :  { %300 = vmatmul.msk.f32.vlgmr.msra.gmra.mxu0 %vm44_vm0, %v36_v25  ;;  %302 = vmatmul.msk.f32.vlgmr.msra.gmra.mxu1 %vm44_vm0, %v38_v26 }
  0x42   :  { %304 = vmatmul.msk.f32.vlgmr.msra.gmra.mxu2 %vm44_vm0, %v40_v27  ;;  %306 = vmatmul.msk.f32.vlgmr.msra.gmra.mxu3 %vm44_vm0, %v42_v28 }
  0x49   :  { %301 = vmatmul.msk.f32.gmra.mxu0 %vm44_vm0, %v37_v29  ;;  %303 = vmatmul.msk.f32.gmra.mxu1 %vm44_vm0, %v39_v30 }
  0x4a   :  { %305 = vmatmul.msk.f32.gmra.mxu2 %vm44_vm0, %v41_v31  ;;  %307 = vmatmul.msk.f32.gmra.mxu3 %vm44_vm0, %v43_v32 }
  0x66   :  { %v190_v44 = vpop.permute.xlu2 %189 }
  0x67   :  { %v214_v50 = vadd.f32 %v363_v36, %v190_v44 }
  0x6e   :  { %v195_v7 = vpop.permute.xlu2 %194 }
  0x6f   :  { %v215_v19 = vadd.f32 %v363_v36, %v195_v7 }
  0x7a   :  { %v170_v33 = vpop.permute.xlu0 %169  ;;  %v180_v34 = vpop.permute.xlu1 %179 }
  0x7b   :  { %v212_v39 = vadd.f32 %v363_v36, %v180_v34  ;;  %v210_v40 = vadd.f32 %v363_v36, %v170_v33 }
  0x82   :  { %v175_v35 = vpop.permute.xlu0 %174  ;;  %v185_v43 = vpop.permute.xlu1 %184 }
  0x83   :  { %v213_v55 = vadd.f32 %v363_v36, %v185_v43  ;;  %v211_v61 = vadd.f32 %v363_v36, %v175_v35 }
  0x8a   :  { %v200_v47 = vpop.permute.xlu0 %199  ;;  %v205_v4 = vpop.permute.xlu1 %204 }
  0x8b   :  { %v216_v56 = vadd.f32 %v363_v36, %v200_v47  ;;  %v217_v13 = vadd.f32 %v363_v36, %v205_v4 }
  0xbe   :  { %v134_v37 = vpop.f32.mrf.mxu0  ;;  %v140_v38 = vpop.f32.mrf.mxu1 }
  0xbf   :  { %v218_v41 = vmul.f32 2.0, %v134_v37  ;;  %v220_v42 = vmul.f32 2.0, %v140_v38 }
  0xc1   :  { %v226_v45 = vsub.f32 %v210_v40, %v218_v41  ;;  %v228_v46 = vsub.f32 %v212_v39, %v220_v42 }
  0xc3   :  { %v234_v48 = vmul.f32 -0.5, %v226_v45  ;;  %v236_v49 = vmul.f32 -0.5, %v228_v46 }
  0xc5   :  { %v242_v51 = vmul.f32 1.442695, %v234_v48  ;;  %v246_v52 = vmul.f32 1.442695, %v236_v49  ;;  %v146_v53 = vpop.f32.mrf.mxu2  ;;  %v152_v54 = vpop.f32.mrf.mxu3 }
  0xc6   :  { %v222_v57 = vmul.f32 2.0, %v146_v53  ;;  %v224_v58 = vmul.f32 2.0, %v152_v54  ;;  %v137_v59 = vpop.f32.mrf.mxu0  ;;  %v143_v60 = vpop.f32.mrf.mxu1 }
  0xc7   :  { %364 = vpow2.f32 %v242_v51  ;;  %v219_v62 = vmul.f32 2.0, %v137_v59  ;;  %v221_v63 = vmul.f32 2.0, %v143_v60 }
  0xc8   :  { %366 = vpow2.f32 %v246_v52  ;;  %v230_v0 = vsub.f32 %v214_v50, %v222_v57  ;;  %v232_v1 = vsub.f32 %v216_v56, %v224_v58 }
  0xc9   :  { %v227_v2 = vsub.f32 %v211_v61, %v219_v62  ;;  %v229_v3 = vsub.f32 %v213_v55, %v221_v63 }
  0xca   :  { %v238_v5 = vmul.f32 -0.5, %v230_v0  ;;  %v240_v6 = vmul.f32 -0.5, %v232_v1 }
  0xcb   :  { %v235_v8 = vmul.f32 -0.5, %v227_v2  ;;  %v237_v9 = vmul.f32 -0.5, %v229_v3 }
  0xcc   :  { %v250_v10 = vmul.f32 1.442695, %v238_v5  ;;  %v254_v11 = vmul.f32 1.442695, %v240_v6 }
  0xcd   :  { %v365_v12 = vpop.eup %364  ;;  %v244_v14 = vmul.f32 1.442695, %v235_v8  ;;  %v248_v15 = vmul.f32 1.442695, %v237_v9  ;;  %v149_v16 = vpop.f32.mrf.mxu2 }
  0xce   :  { %v155_v17 = vpop.f32.mrf.mxu3  ;;  %v367_v18 = vpop.eup %366  ;;  %258 = vst [vmem:[#allocation2] sm:$0xff] %v365_v12  ;;  %368 = vpow2.f32 %v250_v10  ;;  %v223_v20 = vmul.f32 2.0, %v149_v16 }
  0xcf   :  { %v225_v21 = vmul.f32 2.0, %v155_v17  ;;  %260 = vst [vmem:[#allocation2 + $0x10] sm:$0xff] %v367_v18  ;;  %370 = vpow2.f32 %v254_v11 }
  0xd0   :  { %372 = vpow2.f32 %v244_v14  ;;  %v231_v22 = vsub.f32 %v215_v19, %v223_v20 }
  0xd1   :  { %v233_v23 = vsub.f32 %v217_v13, %v225_v21  ;;  %374 = vpow2.f32 %v248_v15 }
  0xd2   :  { %v239_v24 = vmul.f32 -0.5, %v231_v22 }
  0xd3   :  { %v241_v25 = vmul.f32 -0.5, %v233_v23 }
  0xd4   :  { %v369_v26 = vpop.eup %368  ;;  %v252_v27 = vmul.f32 1.442695, %v239_v24 }
  0xd5   :  { %v256_v28 = vmul.f32 1.442695, %v241_v25  ;;  %v371_v29 = vpop.eup %370  ;;  %262 = vst [vmem:[#allocation2 + $0x20] sm:$0xff] %v369_v26 }
  0xd6   :  { %v373_v30 = vpop.eup %372  ;;  %264 = vst [vmem:[#allocation2 + $0x30] sm:$0xff] %v371_v29  ;;  %376 = vpow2.f32 %v252_v27 }
  0xd7   :  { %v375_v31 = vpop.eup %374  ;;  %259 = vst [vmem:[#allocation2 + $0x8] sm:$0xff] %v373_v30  ;;  %378 = vpow2.f32 %v256_v28 }
  0xd8   :  { %261 = vst [vmem:[#allocation2 + $0x18] sm:$0xff] %v375_v31 }
  0xdc   :  { %v377_v32 = vpop.eup %376 }
  0xdd   :  { %v379_v33 = vpop.eup %378  ;;  %263 = vst [vmem:[#allocation2 + $0x28] sm:$0xff] %v377_v32 }
  0xde   :  { %265 = vst [vmem:[#allocation2 + $0x38] sm:$0xff] %v379_v33 }
  0xdf   :  { %278 = dma.vmem_to_hbm [thread:$0]  %s271_s3, 1024, %s273_s29, [#allocation3], %s408_s30, %s408_s30, %s409_s5  }
  0xe0   :  { %404 = dma.done.wait [#allocation3], 1024  }
  0xe1   :  { %405 = vsyncadd [#allocation3], 4294966272 }
  0xe2   :  { %283 = vsyncpa [#allocation3], 1 }

</bundles_post_ra>
